<compile_context>
chip_gen: v7x
topology: tpu7x:2x2x1
jax: 0.10.0
libtpu: 0.0.40
codegen_flags: <defaults>
</compile_context>

<pallas_src>
import functools

import jax
import jax.numpy as jnp
from jax.experimental import pallas as pl
from jax.experimental.pallas import tpu as pltpu

LANE = 128  # vreg lane width; only feature dims >= 128 are padded to this.


def _round_up(v: int, m: int) -> int:
    return (v + m - 1) // m * m


def _maybe_pad_dim(d: int) -> int:
    """Lane-pad only dims that are already >= 128.

    For tiny feature dims, padding to 128 would make the kernel DMA-bound on
    pure padding; a block whose last dim equals the full array dim is legal,
    so small dims stay exact (masked loads/stores are cheap by comparison)."""
    return d if d < LANE else _round_up(d, LANE)


def _device_kind() -> str:
    try:
        return jax.devices()[0].device_kind.lower()
    except Exception:
        return ""


def _vmem_capacity_bytes(kind: str) -> int:
    try:
        return int(pltpu.get_tpu_info().vmem_capacity_bytes)
    except Exception:
        # v7x: 64 MiB per TensorCore; v4/v5/v6: 128 MiB.
        return (64 << 20) if "7" in kind else (128 << 20)


@functools.cache
def _buffered_one_supported() -> bool:
    """One-time capability probe: can this jax/Mosaic lower
    pipeline_mode=pl.Buffered(1) (single-buffered resident operands)?

    Done as an explicit tiny compile instead of a try/except around the real
    pallas_call, so the decision is made once (and works under an outer jit)
    and never masks genuine VMEM-limit / lowering errors of the real kernel."""
    if not hasattr(pl, "Buffered"):
        return False

    def probe_kernel(x_ref, o_ref):
        o_ref[...] = x_ref[...] + 1.0

    try:
        probe = pl.pallas_call(
            probe_kernel,
            out_shape=jax.ShapeDtypeStruct((16, 128), jnp.float32),
            grid_spec=pltpu.PrefetchScalarGridSpec(
                num_scalar_prefetch=0,
                grid=(2,),
                in_specs=[pl.BlockSpec((8, 128), lambda i: (0, 0),
                                       pipeline_mode=pl.Buffered(1))],
                out_specs=pl.BlockSpec((8, 128), lambda i: (i, 0)),
            ),
        )
        jax.jit(probe).lower(
            jax.ShapeDtypeStruct((8, 128), jnp.float32)).compile()
        return True
    except Exception:
        return False


@functools.cache
def _bf16_softplus_supported() -> bool:
    """One-time probe: does Mosaic lower a bf16 softplus (exp/log1p) chain?"""
    def probe_kernel(x_ref, o_ref):
        o_ref[...] = jax.nn.softplus(
            x_ref[...].astype(jnp.bfloat16)).astype(jnp.float32)

    try:
        probe = pl.pallas_call(
            probe_kernel,
            out_shape=jax.ShapeDtypeStruct((16, 128), jnp.float32))
        jax.jit(probe).lower(
            jax.ShapeDtypeStruct((16, 128), jnp.float32)).compile()
        return True
    except Exception:
        return False


def _resolve_act_dtype(requested, kind: str):
    """Dtype for the bias-add + softplus chain.

    v6e/v7x have bf16 VPU/EUP, so bf16 roughly halves the EUP work and the
    materialized intermediate for large hidden; v5e and older lack bf16
    transcendentals, so keep f32 math there (the cast to the matmul dtype is
    still fused so only one hidden copy is materialized)."""
    if requested is not None:
        return requested
    if any(v in kind for v in ("v2", "v3", "v4", "v5")):
        return jnp.float32
    return jnp.bfloat16 if _bf16_softplus_supported() else jnp.float32


def _choose_block_rows(n_rows, row_align, *, per_row_hbm, per_row_vmem,
                       min_steps, target_cap):
    """Row-tile size (multiple of row_align).

    Big enough that each grid step moves >= ~1 MiB of x+out HBM traffic
    (amortizes the ~0.35 us per-step overhead), capped by `target_cap` and a
    ~4 MiB VMEM budget for the row tile, and small enough to leave at least
    `min_steps` grid steps (>= 2 per TensorCore on v7x) when N allows."""
    want = _round_up(max(256, pl.cdiv(1 << 20, max(1, per_row_hbm))), row_align)
    vmem_rows = max(row_align,
                    ((4 << 20) // max(1, per_row_vmem)) // row_align * row_align)
    target = min(target_cap, want, vmem_rows)
    br = max(row_align, min(target, _round_up(n_rows, row_align)))
    if n_rows >= min_steps * row_align:
        br = min(br, max(row_align, (n_rows // min_steps) // row_align * row_align))
    return br


def prepare_mlp_params(w1, b1, w2, b2, w3, b3, *, compute_dtype=jnp.bfloat16):
    """Pad (>=128 dims only, with zero ROWS) and cast the weights ONCE.

    Zero-padded weight rows mean padded hidden-activation columns
    (softplus(0)=ln 2) only ever multiply zeros, so padding is exact.
    Call this at parameter-setup time and reuse across forward calls so the
    pad/convert work is not redone per GNN layer/step."""
    in_feats, hidden = w1.shape
    out_feats = w3.shape[1]
    assert w2.shape == (hidden, hidden) and w3.shape == (hidden, out_feats)
    assert b1.shape == (hidden,) and b2.shape == (hidden,) and b3.shape == (out_feats,)

    in_p, hid_p, out_p = map(_maybe_pad_dim, (in_feats, hidden, out_feats))

    def pad2(a, r, c):
        return jnp.pad(a, ((0, r - a.shape[0]), (0, c - a.shape[1])))

    return dict(
        w1=pad2(w1, in_p, hid_p).astype(compute_dtype),
        w2=pad2(w2, hid_p, hid_p).astype(compute_dtype),
        w3=pad2(w3, hid_p, out_p).astype(compute_dtype),
        b1=jnp.pad(b1, (0, hid_p - hidden)).reshape(1, hid_p).astype(jnp.float32),
        b2=jnp.pad(b2, (0, hid_p - hidden)).reshape(1, hid_p).astype(jnp.float32),
        b3=jnp.pad(b3, (0, out_p - out_feats)).reshape(1, out_p).astype(jnp.float32),
        dims=(in_feats, hidden, out_feats),
        compute_dtype=compute_dtype,
    )


@functools.cache
def _make_mlp_kernel(compute_dtype, act_dtype):
    cd, ad = compute_dtype, act_dtype

    def kernel(x_ref, w1_ref, b1_ref, w2_ref, b2_ref, w3_ref, b3_ref, o_ref):
        # Layer 1: MXU matmul with f32 accumulation; bias-add + softplus in
        # act_dtype, fused with the cast so only the compute-dtype hidden
        # activation is materialized.
        h = jnp.dot(x_ref[...].astype(cd), w1_ref[...],
                    preferred_element_type=jnp.float32)
        h = jax.nn.softplus((h + b1_ref[...]).astype(ad)).astype(cd)
        # Layer 2.
        h = jnp.dot(h, w2_ref[...], preferred_element_type=jnp.float32)
        h = jax.nn.softplus((h + b2_ref[...]).astype(ad)).astype(cd)
        # Layer 3 (no activation).
        y = jnp.dot(h, w3_ref[...], preferred_element_type=jnp.float32)
        o_ref[...] = (y + b3_ref[...]).astype(o_ref.dtype)

    return kernel


def mlp_forward(x, params, *, block_rows=None, act_dtype=None):
    """Fused 3-layer MLP: y = L3(softplus(L2(softplus(L1(x))))).

    x: (N, in_feats), any float dtype (cast to the matmul dtype inside the
    kernel so HBM only moves x once).  params: output of prepare_mlp_params.
    """
    in_feats, hidden, out_feats = params["dims"]
    cd = params["compute_dtype"]
    w1, b1, w2, b2, w3, b3 = (params[k] for k in ("w1", "b1", "w2", "b2", "w3", "b3"))
    in_p, hid_p = w1.shape
    out_p = w3.shape[1]

    N = x.shape[0]
    assert x.shape[1] == in_feats
    out_dtype = x.dtype
    kind = _device_kind()
    ad = _resolve_act_dtype(act_dtype, kind)

    cbytes = jnp.dtype(cd).itemsize
    xbytes = jnp.dtype(x.dtype).itemsize
    obytes = jnp.dtype(out_dtype).itemsize
    row_align = 8 * max(1, 4 // cbytes)  # 16 rows for bf16 sublane packing

    # Column-pad x only when in_feats itself needed lane-padding (>=128 and
    # misaligned); the common GNN case (tiny feature dims) moves x unpadded.
    if in_p != in_feats:
        x = jnp.pad(x, ((0, 0), (0, in_p - in_feats)))

    if block_rows is None:
        is_v5e = ("v5e" in kind) or ("v5 lite" in kind) or ("v5lite" in kind)
        min_steps = 4 if "7" in kind else 2  # v7x shards 'parallel' over 2 TCs
        block_rows = _choose_block_rows(
            N, row_align,
            per_row_hbm=in_p * xbytes + out_p * obytes,
            per_row_vmem=in_p * xbytes + out_p * obytes + hid_p * (4 + cbytes),
            min_steps=min_steps,
            target_cap=256 if is_v5e else 1024)
    block_rows = max(row_align, _round_up(block_rows, row_align))
    grid = (pl.cdiv(N, block_rows),)  # ragged last row block is masked by Pallas

    # Single-buffer the resident (constant-block-index) weights when supported.
    use_single_buf = _buffered_one_supported()
    wkw = dict(pipeline_mode=pl.Buffered(1)) if use_single_buf else {}
    wbuf = 1 if use_single_buf else 2

    weight_bytes = (in_p * hid_p + hid_p * hid_p + hid_p * out_p) * cbytes
    bias_bytes = (2 * _round_up(hid_p, LANE) + _round_up(out_p, LANE)) * 8 * 4
    footprint = (
        2 * block_rows * in_p * xbytes            # x tile (double-buffered)
        + 2 * block_rows * out_p * obytes         # out tile (double-buffered)
        + wbuf * weight_bytes + 2 * bias_bytes    # resident weights / biases
        + 2 * block_rows * hid_p * (4 + cbytes)   # live f32 pre-act + cd hidden
    )
    vmem_cap = _vmem_capacity_bytes(kind)
    vmem_limit = int(min(vmem_cap - (16 << 20),   # headroom for Mosaic scratch
                         max(2 * footprint + (1 << 20), 8 << 20)))
    vmem_limit = max(vmem_limit, 4 << 20)

    cost = pl.CostEstimate(
        flops=2 * N * (in_p * hid_p + hid_p * hid_p + hid_p * out_p),
        transcendentals=4 * N * hid_p,            # exp + log1p per softplus, 2 layers
        bytes_accessed=int(N * in_p * xbytes + weight_bytes
                           + (2 * hid_p + out_p) * 4 + N * out_p * obytes),
    )

    rows_map = lambda i: (i, 0)
    rep_map = lambda i: (0, 0)

    y = pl.pallas_call(
        _make_mlp_kernel(cd, ad),
        out_shape=jax.ShapeDtypeStruct((N, out_p), out_dtype),
        grid_spec=pltpu.PrefetchScalarGridSpec(
            num_scalar_prefetch=0,
            grid=grid,
            in_specs=[
                pl.BlockSpec((block_rows, in_p), rows_map),    # x row tile
                pl.BlockSpec((in_p, hid_p), rep_map, **wkw),   # W1 (resident)
                pl.BlockSpec((1, hid_p), rep_map),             # b1
                pl.BlockSpec((hid_p, hid_p), rep_map, **wkw),  # W2 (resident)
                pl.BlockSpec((1, hid_p), rep_map),             # b2
                pl.BlockSpec((hid_p, out_p), rep_map, **wkw),  # W3 (resident)
                pl.BlockSpec((1, out_p), rep_map),             # b3
            ],
            out_specs=pl.BlockSpec((block_rows, out_p), rows_map),
        ),
        compiler_params=pltpu.CompilerParams(
            dimension_semantics=("parallel",),
            vmem_limit_bytes=vmem_limit,
        ),
        cost_estimate=cost,
    )(x, w1, b1, w2, b2, w3, b3)

    # TODO(synk): for hidden >= ~2048 (bf16 W2 alone >= 8 MiB) add an
    # 'arbitrary' grid axis that K/N-tiles W2/W3 instead of keeping the full
    # weights resident (hits v7x's 64 MiB VMEM first, v5e/v6e roughly 2x later).
    return y if out_p == out_feats else y[:, :out_feats]


def _mlp_reference(x, w1, b1, w2, b2, w3, b3, *, compute_dtype, act_dtype):
    """Pure-JAX reference using the same matmul/activation dtype recipe."""
    cd, ad = compute_dtype, act_dtype
    h = jnp.dot(x.astype(cd), w1.astype(cd), preferred_element_type=jnp.float32)
    h = jax.nn.softplus((h + b1).astype(ad)).astype(cd)
    h = jnp.dot(h, w2.astype(cd), preferred_element_type=jnp.float32)
    h = jax.nn.softplus((h + b2).astype(ad)).astype(cd)
    y = jnp.dot(h, w3.astype(cd), preferred_element_type=jnp.float32)
    return (y + b3).astype(x.dtype)


def init_linear(key, fan_in, fan_out, dtype=jnp.float32):
    """PyTorch-default-style init (uniform +/- 1/sqrt(fan_in)); weight returned
    pre-transposed to (fan_in, fan_out) so the kernel computes x @ W + b."""
    kw, kb = jax.random.split(key)
    bound = 1.0 / float(fan_in) ** 0.5
    w = jax.random.uniform(kw, (fan_in, fan_out), dtype, -bound, bound)
    b = jax.random.uniform(kb, (fan_out,), dtype, -bound, bound)
    return w, b


if __name__ == "__main__":
    # Shapes consistent with the module's GNN usage: feat is (batch, in_feats)
    # with small feature dims; batch=64 gives a multi-step 'parallel' grid.
    batch, in_feats, hidden, out_feats = 64, 16, 32, 8

    key = jax.random.PRNGKey(0)
    kx, k1, k2, k3 = jax.random.split(key, 4)

    x = jax.random.normal(kx, (batch, in_feats), jnp.float32)
    w1, b1 = init_linear(k1, in_feats, hidden)
    w2, b2 = init_linear(k2, hidden, hidden)
    w3, b3 = init_linear(k3, hidden, out_feats)

    params = prepare_mlp_params(w1, b1, w2, b2, w3, b3)   # pad/cast ONCE
    act_dtype = _resolve_act_dtype(None, _device_kind())  # f32 on <=v5, bf16 on v6e/v7x

    y = mlp_forward(x, params, act_dtype=act_dtype)
    y = jax.block_until_ready(y)
    assert y.shape == (batch, out_feats)

    y_ref = _mlp_reference(x, w1, b1, w2, b2, w3, b3,
                           compute_dtype=params["compute_dtype"],
                           act_dtype=act_dtype)
    # f32 softplus matches the reference tightly; the bf16 softplus path
    # (v6e/v7x) differs from XLA's softplus by a few bf16 ulps which get
    # amplified through two more layers, so use a correspondingly looser tol.
    tol = 1e-4 if act_dtype is jnp.float32 else 1e-1
    yf, rf = y.astype(jnp.float32), y_ref.astype(jnp.float32)
    max_diff = float(jnp.max(jnp.abs(yf - rf)))
    assert jnp.allclose(yf, rf, atol=tol, rtol=tol), (
        f"mismatch vs reference, max abs diff = {max_diff}")

    print("KERNEL_OK")
</pallas_src>

<mosaic_0001>
module attributes {stable_mosaic.version = 11 : i64} {
  func.func @kernel(%arg0: i32, %arg1: memref<32x16xf32, #tpu.memory_space<vmem>>, %arg2: memref<16x32xbf16, #tpu.memory_space<vmem>>, %arg3: memref<1x32xf32, #tpu.memory_space<vmem>>, %arg4: memref<32x32xbf16, #tpu.memory_space<vmem>>, %arg5: memref<1x32xf32, #tpu.memory_space<vmem>>, %arg6: memref<32x8xbf16, #tpu.memory_space<vmem>>, %arg7: memref<1x8xf32, #tpu.memory_space<vmem>>, %arg8: memref<32x8xf32, #tpu.memory_space<vmem>>) attributes {dimension_semantics = [#tpu.dimension_semantics<parallel>], iteration_bounds = array<i64: 2>, scalar_prefetch = 0 : i64, scratch_operands = 0 : i64, tpu.core_type = #tpu.core_type<tc>, window_params = [{transform_indices = @transform_0, window_bounds = array<i64: 32, 16>}, {pipeline_mode = #tpu.pipeline_mode<synchronous>, transform_indices = @transform_1, window_bounds = array<i64: 16, 32>}, {pipeline_mode = #tpu.pipeline_mode<synchronous>, transform_indices = @transform_2, window_bounds = array<i64: 1, 32>}, {pipeline_mode = #tpu.pipeline_mode<synchronous>, transform_indices = @transform_3, window_bounds = array<i64: 32, 32>}, {pipeline_mode = #tpu.pipeline_mode<synchronous>, transform_indices = @transform_4, window_bounds = array<i64: 1, 32>}, {pipeline_mode = #tpu.pipeline_mode<synchronous>, transform_indices = @transform_5, window_bounds = array<i64: 32, 8>}, {pipeline_mode = #tpu.pipeline_mode<synchronous>, transform_indices = @transform_6, window_bounds = array<i64: 1, 8>}, {transform_indices = @transform_7, window_bounds = array<i64: 32, 8>}]} {
    %c0 = arith.constant 0 : index
    %c0_0 = arith.constant 0 : index
    %0 = vector.load %arg1[%c0, %c0_0] : memref<32x16xf32, #tpu.memory_space<vmem>>, vector<32x16xf32>
    %1 = arith.truncf %0 : vector<32x16xf32> to vector<32x16xbf16>
    %c0_1 = arith.constant 0 : index
    %c0_2 = arith.constant 0 : index
    %2 = vector.load %arg2[%c0_1, %c0_2] : memref<16x32xbf16, #tpu.memory_space<vmem>>, vector<16x32xbf16>
    %cst = arith.constant dense<0.000000e+00> : vector<32x32xf32>
    %3 = tpu.matmul %1, %2, %cst {dimension_numbers = #tpu.dot_dimension_numbers<[1], [0], [0], [1], [0, 0, 1, 1], [], []>} : vector<32x16xbf16>, vector<16x32xbf16>, vector<32x32xf32> -> vector<32x32xf32>
    %c0_3 = arith.constant 0 : index
    %c0_4 = arith.constant 0 : index
    %4 = vector.load %arg3[%c0_3, %c0_4] : memref<1x32xf32, #tpu.memory_space<vmem>>, vector<1x32xf32>
    %5 = vector.broadcast %4 : vector<1x32xf32> to vector<32x32xf32>
    %6 = arith.addf %3, %5 : vector<32x32xf32>
    %cst_5 = arith.constant 0.000000e+00 : f32
    %7 = vector.broadcast %cst_5 : f32 to vector<32x32xf32>
    %8 = arith.maximumf %6, %7 : vector<32x32xf32>
    %9 = vector.broadcast %cst_5 : f32 to vector<32x32xf32>
    %10 = arith.subf %6, %9 : vector<32x32xf32>
    %11 = arith.cmpf one, %10, %10 : vector<32x32xf32>
    %12 = vector.broadcast %cst_5 : f32 to vector<32x32xf32>
    %13 = arith.addf %6, %12 : vector<32x32xf32>
    %14 = math.absf %10 : vector<32x32xf32>
    %cst_6 = arith.constant 0.000000e+00 : f32
    %15 = vector.broadcast %cst_6 : f32 to vector<32x32xf32>
    %16 = arith.subf %15, %14 : vector<32x32xf32>
    %17 = math.exp %16 : vector<32x32xf32>
    %18 = math.log1p %17 : vector<32x32xf32>
    %19 = arith.addf %8, %18 : vector<32x32xf32>
    %20 = arith.select %11, %13, %19 : vector<32x32xi1>, vector<32x32xf32>
    %21 = arith.truncf %20 : vector<32x32xf32> to vector<32x32xbf16>
    %c0_7 = arith.constant 0 : index
    %c0_8 = arith.constant 0 : index
    %22 = vector.load %arg4[%c0_7, %c0_8] : memref<32x32xbf16, #tpu.memory_space<vmem>>, vector<32x32xbf16>
    %cst_9 = arith.constant dense<0.000000e+00> : vector<32x32xf32>
    %23 = tpu.matmul %21, %22, %cst_9 {dimension_numbers = #tpu.dot_dimension_numbers<[1], [0], [0], [1], [0, 0, 1, 1], [], []>} : vector<32x32xbf16>, vector<32x32xbf16>, vector<32x32xf32> -> vector<32x32xf32>
    %c0_10 = arith.constant 0 : index
    %c0_11 = arith.constant 0 : index
    %24 = vector.load %arg5[%c0_10, %c0_11] : memref<1x32xf32, #tpu.memory_space<vmem>>, vector<1x32xf32>
    %25 = vector.broadcast %24 : vector<1x32xf32> to vector<32x32xf32>
    %26 = arith.addf %23, %25 : vector<32x32xf32>
    %cst_12 = arith.constant 0.000000e+00 : f32
    %27 = vector.broadcast %cst_12 : f32 to vector<32x32xf32>
    %28 = arith.maximumf %26, %27 : vector<32x32xf32>
    %29 = vector.broadcast %cst_12 : f32 to vector<32x32xf32>
    %30 = arith.subf %26, %29 : vector<32x32xf32>
    %31 = arith.cmpf one, %30, %30 : vector<32x32xf32>
    %32 = vector.broadcast %cst_12 : f32 to vector<32x32xf32>
    %33 = arith.addf %26, %32 : vector<32x32xf32>
    %34 = math.absf %30 : vector<32x32xf32>
    %cst_13 = arith.constant 0.000000e+00 : f32
    %35 = vector.broadcast %cst_13 : f32 to vector<32x32xf32>
    %36 = arith.subf %35, %34 : vector<32x32xf32>
    %37 = math.exp %36 : vector<32x32xf32>
    %38 = math.log1p %37 : vector<32x32xf32>
    %39 = arith.addf %28, %38 : vector<32x32xf32>
    %40 = arith.select %31, %33, %39 : vector<32x32xi1>, vector<32x32xf32>
    %41 = arith.truncf %40 : vector<32x32xf32> to vector<32x32xbf16>
    %c0_14 = arith.constant 0 : index
    %c0_15 = arith.constant 0 : index
    %42 = vector.load %arg6[%c0_14, %c0_15] : memref<32x8xbf16, #tpu.memory_space<vmem>>, vector<32x8xbf16>
    %cst_16 = arith.constant dense<0.000000e+00> : vector<32x8xf32>
    %43 = tpu.matmul %41, %42, %cst_16 {dimension_numbers = #tpu.dot_dimension_numbers<[1], [0], [0], [1], [0, 0, 1, 1], [], []>} : vector<32x32xbf16>, vector<32x8xbf16>, vector<32x8xf32> -> vector<32x8xf32>
    %c0_17 = arith.constant 0 : index
    %c0_18 = arith.constant 0 : index
    %44 = vector.load %arg7[%c0_17, %c0_18] : memref<1x8xf32, #tpu.memory_space<vmem>>, vector<1x8xf32>
    %45 = vector.broadcast %44 : vector<1x8xf32> to vector<32x8xf32>
    %46 = arith.addf %43, %45 : vector<32x8xf32>
    %c0_19 = arith.constant 0 : index
    %c0_20 = arith.constant 0 : index
    %47 = vector.load %arg8[%c0_19, %c0_20] : memref<32x8xf32, #tpu.memory_space<vmem>>, vector<32x8xf32>
    tpu.vector_store %arg8[%c0_19, %c0_20], %46 {strides = array<i32>} : memref<32x8xf32, #tpu.memory_space<vmem>>, vector<32x8xf32>,
    return
  }
  func.func @transform_0(%arg0: i32) -> (i32, i32) {
    %c0_i32 = arith.constant 0 : i32
    %c0_i32_0 = arith.constant 0 : i32
    return %arg0, %c0_i32 : i32, i32
  }
  func.func @transform_1(%arg0: i32) -> (i32, i32) {
    %c0_i32 = arith.constant 0 : i32
    %c0_i32_0 = arith.constant 0 : i32
    %c0_i32_1 = arith.constant 0 : i32
    return %c0_i32, %c0_i32_0 : i32, i32
  }
  func.func @transform_2(%arg0: i32) -> (i32, i32) {
    %c0_i32 = arith.constant 0 : i32
    %c0_i32_0 = arith.constant 0 : i32
    %c0_i32_1 = arith.constant 0 : i32
    return %c0_i32, %c0_i32_0 : i32, i32
  }
  func.func @transform_3(%arg0: i32) -> (i32, i32) {
    %c0_i32 = arith.constant 0 : i32
    %c0_i32_0 = arith.constant 0 : i32
    %c0_i32_1 = arith.constant 0 : i32
    return %c0_i32, %c0_i32_0 : i32, i32
  }
  func.func @transform_4(%arg0: i32) -> (i32, i32) {
    %c0_i32 = arith.constant 0 : i32
    %c0_i32_0 = arith.constant 0 : i32
    %c0_i32_1 = arith.constant 0 : i32
    return %c0_i32, %c0_i32_0 : i32, i32
  }
  func.func @transform_5(%arg0: i32) -> (i32, i32) {
    %c0_i32 = arith.constant 0 : i32
    %c0_i32_0 = arith.constant 0 : i32
    %c0_i32_1 = arith.constant 0 : i32
    return %c0_i32, %c0_i32_0 : i32, i32
  }
  func.func @transform_6(%arg0: i32) -> (i32, i32) {
    %c0_i32 = arith.constant 0 : i32
    %c0_i32_0 = arith.constant 0 : i32
    %c0_i32_1 = arith.constant 0 : i32
    return %c0_i32, %c0_i32_0 : i32, i32
  }
  func.func @transform_7(%arg0: i32) -> (i32, i32) {
    %c0_i32 = arith.constant 0 : i32
    %c0_i32_0 = arith.constant 0 : i32
    return %arg0, %c0_i32 : i32, i32
  }
}

</mosaic_0001>

<bundles_post_ra>
// kernel: tpu_custom_call.1
= control target key start
LH: loop header
LB: loop body
LE: loop exit
PB: predicated region body
PF: predicated region fallthrough
CT: control target
= control target key end

     0   :  { %s877_s24 = smov 0   ;;  %s985_s0 = inlined_call_operand.vmem [shape: f32[64,16], index: 0, kind: input, shape index: {}]   ;;  %s986_s1 = inlined_call_operand.vmem [shape: bf16[16,32], index: 1, kind: input, shape index: {}]   ;;  %s987_s2 = inlined_call_operand.vmem [shape: f32[1,32], index: 2, kind: input, shape index: {}]   ;;  %s988_s3 = inlined_call_operand.vmem [shape: bf16[32,32], index: 3, kind: input, shape index: {}]   ;;  %s989_s4 = inlined_call_operand.vmem [shape: f32[1,32], index: 4, kind: input, shape index: {}]   ;;  %s990_s5 = inlined_call_operand.vmem [shape: bf16[32,8], index: 5, kind: input, shape index: {}]   ;;  %s991_s6 = inlined_call_operand.vmem [shape: f32[1,8], index: 6, kind: input, shape index: {}]   ;;  %s992_s7 = inlined_call_operand.vmem [shape: f32[64,8], index: 7, kind: output, shape index: {}]  }
   0x1 LB: > { %s726_s25 = sadd.s32 4294967295, %s835_s24   ;;  %p730_p0 = scmp.ge.s32.totalorder %s835_s24, 1  ;;  %s835_s24 = sphi %s877_s24, %s17_s24  }
   0x2   : > { %p238_p1 = scmp.lt.s32.totalorder %s835_s24, 3 }
   0x4   : > { %p239_p2 = pnand %p730_p0, %p238_p1 }
   0x5   : > { %v792_v0 = vld [vmem:[%s986_s1] sm:$0xff] (!%p239_p2)   ;;  %s731_s28 = sshll.u32 (!%p239_p2), %s726_s25, 2  ;;  %vm304_vm0 = vcmask (!%p239_p2), 130048   ;;  %v794_v8 = vld [vmem:[%s988_s3 + $0x8] sm:$0xff] (!%p239_p2)   ;;  %vm457_vm9 = vcmask (!%p239_p2), 261120  }
   0x6   : > { %242 = sbr.rel (%p239_p2) target bundleno = 750 (0x2ee), region = 48  ;;  %p271_p3 = scmp.lt.s32.totalorder (!%p239_p2), %s731_s28, 7  ;;  %762 = vmatprep.subr.bf16.mxu0 (!%p239_p2), %v792_v0  ;;  %v793_v7 = vld [vmem:[%s988_s3] sm:$0xff] (!%p239_p2)  }
   0x7   : > { %763 = vmatpush3.bf16.msra.mxu0 (!%p239_p2), %v792_v0  ;;  %768 = vmatprep.subr.bf16.mxu1 (!%p239_p2), %v793_v7  ;;  %v735_v9 = vld [vmem:[%s987_s2] ss:$0 sm:$0xff] (!%p239_p2) }
   0x8   : > { %769 = vmatpush3.bf16.msra.mxu1 (!%p239_p2), %v793_v7 }
   0x9   : > { %770 = vmatprep.subr.bf16.mxu1 (!%p239_p2), %v794_v8 }
   0xc   : > { %771 = vmatpush3.bf16.msra.mxu1 (!%p239_p2), %v794_v8 }
   0xd   : > { %s994_s28 = smov (!%p271_p3, %s731_s28), 7 }
   0xe   : > { %s732_s29 = sshll.u32 %s994_s28, 3 }
   0xf   : > { %s274_s9 = scalar_lea.vmem %s985_s0, %s732_s29  ;;  %s280_s27 = scalar_lea.vmem %s992_s7, %s732_s29 }
  0x10   : > { %v283_v1 = vld [vmem:[%s274_s9] sm:$0xff]  ;;  %v284_v2 = vld [vmem:[%s274_s9 + $0x8] sm:$0xff]  ;;  %v285_v3 = vld [vmem:[%s274_s9 + $0x10] sm:$0xff] }
  0x11   : > { %v287_v4 = vpack.c.bf16 %v284_v2, %v283_v1  ;;  %v286_v5 = vld [vmem:[%s274_s9 + $0x18] sm:$0xff] }
  0x12   : > { %v288_v6 = vpack.c.bf16 %v286_v5, %v285_v3 }
  0x13   : > { %764 = vmatprep.mubr.msk.bf16.mxu0 %vm304_vm0, %v287_v4 }
  0x14   : > { %765 = vmatmul.mubr.msk.bf16.vlgmr.msra.gmra.mrb[0].mxu0 %vm304_vm0, %v288_v6 }
  0xe7   : > { %v766_v10 = vpop.f32.mrb[0].mxu0 }
  0xe8   : > { %v905_v11 = vadd.f32 %v766_v10, %v735_v9  ;;  %v345_v12 = vpop.f32.mrb[1].mxu0 }
  0xe9   : > { %v907_v13 = vadd.f32 %v735_v9, %v345_v12  ;;  %v767_v14 = vpop.f32.mrb[2].mxu0 }
  0xea   : > { %v374_v15 = vand.u32 2147483647, %v905_v11  ;;  %v910_v16 = vadd.f32 %v767_v14, %v735_v9  ;;  %v348_v17 = vpop.f32.mrb[3].mxu0  ;;  %v362_v48 = vmax.f32 %v905_v11, 0.0  ;;  %vm366_vm5 = vcmp.ne.f32.partialorder %v905_v11, %v905_v11 }
  0xeb   : > { %v372_v18 = vand.u32 2147483647, %v907_v13  ;;  %v913_v19 = vadd.f32 %v735_v9, %v348_v17  ;;  %v360_v53 = vmax.f32 %v907_v13, 0.0  ;;  %vm364_vm7 = vcmp.ne.f32.partialorder %v907_v13, %v907_v13 }
  0xec   : > { %v378_v20 = vsub.f32 0.0, %v374_v15  ;;  %v375_v21 = vand.u32 2147483647, %v910_v16  ;;  %v363_v0 = vmax.f32 %v910_v16, 0.0  ;;  %vm367_vm6 = vcmp.ne.f32.partialorder %v910_v16, %v910_v16 }
  0xed   : > { %v376_v22 = vsub.f32 0.0, %v372_v18  ;;  %v373_v23 = vand.u32 2147483647, %v913_v19  ;;  %v361_v6 = vmax.f32 %v913_v19, 0.0  ;;  %vm365_vm8 = vcmp.ne.f32.partialorder %v913_v19, %v913_v19 }
  0xee   : > { %v384_v24 = vmul.f32 1.442695, %v378_v20  ;;  %v379_v25 = vsub.f32 0.0, %v375_v21 }
  0xef   : > { %v380_v26 = vmul.f32 1.442695, %v376_v22  ;;  %v377_v27 = vsub.f32 0.0, %v373_v23 }
  0xf0   : > { %797 = vpow2.f32 %v384_v24  ;;  %v386_v28 = vmul.f32 1.442695, %v379_v25 }
  0xf1   : > { %799 = vpow2.f32 %v380_v26  ;;  %v382_v29 = vmul.f32 1.442695, %v377_v27 }
  0xf2   : > { %801 = vpow2.f32 %v386_v28 }
  0xf3   : > { %803 = vpow2.f32 %v382_v29 }
  0xfa   : > { %v798_v30 = vpop.eup %797 }
  0xfb   : > { %v800_v31 = vpop.eup %799  ;;  %v406_v32 = vadd.f32 1.0, %v798_v30  ;;  %v409_v38 = vmul.f32 -0.5, %v798_v30  ;;  %v412_v43 = vand.u32 2147483647, %v798_v30 }
  0xfc   : > { %v802_v33 = vpop.eup %801  ;;  %v388_v34 = vadd.f32 1.0, %v800_v31  ;;  %v391_v39 = vmul.f32 -0.5, %v800_v31  ;;  %v394_v46 = vand.u32 2147483647, %v800_v31 }
  0xfd   : > { %v804_v35 = vpop.eup %803  ;;  %805 = vlog2.f32 %v406_v32  ;;  %v415_v36 = vadd.f32 1.0, %v802_v33  ;;  %v418_v40 = vmul.f32 -0.5, %v802_v33  ;;  %v410_v41 = vadd.f32 1.0, %v409_v38 }
  0xfe   : > { %807 = vlog2.f32 %v388_v34  ;;  %v397_v37 = vadd.f32 1.0, %v804_v35  ;;  %v400_v42 = vmul.f32 -0.5, %v804_v35  ;;  %v392_v44 = vadd.f32 1.0, %v391_v39 }
  0xff   : > { %809 = vlog2.f32 %v415_v36  ;;  %v419_v45 = vadd.f32 1.0, %v418_v40  ;;  %v421_v49 = vand.u32 2147483647, %v802_v33  ;;  %v411_v52 = vmul.f32 %v798_v30, %v410_v41 }
 0x100   : > { %811 = vlog2.f32 %v397_v37  ;;  %v401_v54 = vadd.f32 1.0, %v400_v42  ;;  %vm413_vm1 = vcmp.lt.f32.partialorder %v412_v43, 0.0004427343  ;;  %v393_v57 = vmul.f32 %v800_v31, %v392_v44 }
 0x101   : > { %v403_v58 = vand.u32 2147483647, %v804_v35  ;;  %v420_v61 = vmul.f32 %v802_v33, %v419_v45  ;;  %vm395_vm2 = vcmp.lt.f32.partialorder %v394_v46, 0.0004427343  ;;  %vm422_vm3 = vcmp.lt.f32.partialorder %v421_v49, 0.0004427343 }
 0x102   : > { %v402_v4 = vmul.f32 %v804_v35, %v401_v54 }
 0x103   : > { %vm404_vm4 = vcmp.lt.f32.partialorder %v403_v58, 0.0004427343 }
 0x107   : > { %v806_v47 = vpop.eup %805 }
 0x108   : > { %v808_v50 = vpop.eup %807  ;;  %v408_v51 = vmul.f32 0.6931472, %v806_v47 }
 0x109   : > { %v810_v55 = vpop.eup %809  ;;  %v390_v56 = vmul.f32 0.6931472, %v808_v50 }
 0x10a   : > { %v414_v59 = vsel %vm413_vm1, %v411_v52, %v408_v51  ;;  %v417_v60 = vmul.f32 0.6931472, %v810_v55  ;;  %v812_v62 = vpop.eup %811 }
 0x10b   : > { %v426_v63 = vadd.f32 %v414_v59, %v362_v48  ;;  %v396_v1 = vsel %vm395_vm2, %v393_v57, %v390_v56  ;;  %v399_v3 = vmul.f32 0.6931472, %v812_v62  ;;  %vm665_vm2 = vcmask 64512  }
 0x10c   : > { %v423_v2 = vsel %vm422_vm3, %v420_v61, %v417_v60  ;;  %v424_v7 = vadd.f32 %v396_v1, %v360_v53 }
 0x10d   : > { %v427_v5 = vadd.f32 %v423_v2, %v363_v0  ;;  %v405_v8 = vsel %vm404_vm4, %v402_v4, %v399_v3  ;;  %v430_v10 = vsel %vm366_vm5, %v905_v11, %v426_v63  ;;  %v795_v11 = vld [vmem:[%s990_s5] sm:$0xff]  }
 0x10e   : > { %v425_v9 = vadd.f32 %v405_v8, %v361_v6  ;;  %v428_v15 = vsel %vm364_vm7, %v907_v13, %v424_v7  ;;  %776 = vmatprep.subr.bf16.mxu0 %v795_v11  ;;  %v739_v13 = vld [vmem:[%s989_s4] ss:$0 sm:$0xff] }
 0x10f   : > { %v431_v12 = vsel %vm367_vm6, %v910_v16, %v427_v5  ;;  %777 = vmatpush3.bf16.msra.mxu0 %v795_v11  ;;  %v796_v16 = vld [vmem:[%s990_s5 + $0x8] sm:$0xff]  }
 0x110   : > { %v433_v14 = vpack.c.bf16 %v431_v12, %v430_v10  ;;  %v429_v17 = vsel %vm365_vm8, %v913_v19, %v425_v9  ;;  %778 = vmatprep.subr.bf16.mxu0 %v796_v16 }
 0x111   : > { %v432_v18 = vpack.c.bf16 %v429_v17, %v428_v15 }
 0x113   : > { %772 = vmatprep.mubr.msk.bf16.mxu1 %vm457_vm9, %v432_v18  ;;  %779 = vmatpush3.bf16.msra.mxu0 %v796_v16 }
 0x114   : > { %773 = vmatmul.mubr.msk.bf16.vlgmr.msra.gmra.mrb[0].mxu1 %vm457_vm9, %v433_v14 }
 0x1e7   : > { %v774_v19 = vpop.f32.mrb[0].mxu1 }
 0x1e8   : > { %v944_v20 = vadd.f32 %v774_v19, %v739_v13  ;;  %v498_v21 = vpop.f32.mrb[1].mxu1 }
 0x1e9   : > { %v946_v22 = vadd.f32 %v739_v13, %v498_v21  ;;  %v775_v23 = vpop.f32.mrb[2].mxu1 }
 0x1ea   : > { %v527_v24 = vand.u32 2147483647, %v944_v20  ;;  %v949_v25 = vadd.f32 %v775_v23, %v739_v13  ;;  %v501_v26 = vpop.f32.mrb[3].mxu1  ;;  %v515_v57 = vmax.f32 %v944_v20, 0.0  ;;  %vm519_vm14 = vcmp.ne.f32.partialorder %v944_v20, %v944_v20 }
 0x1eb   : > { %v525_v27 = vand.u32 2147483647, %v946_v22  ;;  %v952_v28 = vadd.f32 %v739_v13, %v501_v26  ;;  %v513_v62 = vmax.f32 %v946_v22, 0.0  ;;  %vm517_vm0 = vcmp.ne.f32.partialorder %v946_v22, %v946_v22 }
 0x1ec   : > { %v531_v29 = vsub.f32 0.0, %v527_v24  ;;  %v528_v30 = vand.u32 2147483647, %v949_v25  ;;  %v516_v10 = vmax.f32 %v949_v25, 0.0  ;;  %vm520_vm15 = vcmp.ne.f32.partialorder %v949_v25, %v949_v25 }
 0x1ed   : > { %v529_v31 = vsub.f32 0.0, %v525_v27  ;;  %v526_v32 = vand.u32 2147483647, %v952_v28  ;;  %v514_v11 = vmax.f32 %v952_v28, 0.0  ;;  %vm518_vm1 = vcmp.ne.f32.partialorder %v952_v28, %v952_v28 }
 0x1ee   : > { %v537_v33 = vmul.f32 1.442695, %v531_v29  ;;  %v532_v34 = vsub.f32 0.0, %v528_v30 }
 0x1ef   : > { %v533_v35 = vmul.f32 1.442695, %v529_v31  ;;  %v530_v36 = vsub.f32 0.0, %v526_v32 }
 0x1f0   : > { %813 = vpow2.f32 %v537_v33  ;;  %v539_v37 = vmul.f32 1.442695, %v532_v34 }
 0x1f1   : > { %815 = vpow2.f32 %v533_v35  ;;  %v535_v38 = vmul.f32 1.442695, %v530_v36 }
 0x1f2   : > { %817 = vpow2.f32 %v539_v37 }
 0x1f3   : > { %819 = vpow2.f32 %v535_v38 }
 0x1fa   : > { %v814_v39 = vpop.eup %813 }
 0x1fb   : > { %v816_v40 = vpop.eup %815  ;;  %v559_v41 = vadd.f32 1.0, %v814_v39  ;;  %v562_v47 = vmul.f32 -0.5, %v814_v39  ;;  %v565_v52 = vand.u32 2147483647, %v814_v39 }
 0x1fc   : > { %v818_v42 = vpop.eup %817  ;;  %v541_v43 = vadd.f32 1.0, %v816_v40  ;;  %v544_v48 = vmul.f32 -0.5, %v816_v40  ;;  %v547_v54 = vand.u32 2147483647, %v816_v40 }
 0x1fd   : > { %v820_v44 = vpop.eup %819  ;;  %821 = vlog2.f32 %v559_v41  ;;  %v568_v45 = vadd.f32 1.0, %v818_v42  ;;  %v571_v49 = vmul.f32 -0.5, %v818_v42  ;;  %v563_v50 = vadd.f32 1.0, %v562_v47 }
 0x1fe   : > { %823 = vlog2.f32 %v541_v43  ;;  %v550_v46 = vadd.f32 1.0, %v820_v44  ;;  %v553_v51 = vmul.f32 -0.5, %v820_v44  ;;  %v545_v53 = vadd.f32 1.0, %v544_v48 }
 0x1ff   : > { %825 = vlog2.f32 %v568_v45  ;;  %v572_v55 = vadd.f32 1.0, %v571_v49  ;;  %v574_v58 = vand.u32 2147483647, %v818_v42  ;;  %v564_v61 = vmul.f32 %v814_v39, %v563_v50 }
 0x200   : > { %827 = vlog2.f32 %v550_v46  ;;  %v554_v63 = vadd.f32 1.0, %v553_v51  ;;  %vm566_vm10 = vcmp.lt.f32.partialorder %v565_v52, 0.0004427343  ;;  %v546_v2 = vmul.f32 %v816_v40, %v545_v53 }
 0x201   : > { %v556_v3 = vand.u32 2147483647, %v820_v44  ;;  %vm548_vm11 = vcmp.lt.f32.partialorder %v547_v54, 0.0004427343  ;;  %v573_v6 = vmul.f32 %v818_v42, %v572_v55  ;;  %vm575_vm12 = vcmp.lt.f32.partialorder %v574_v58, 0.0004427343 }
 0x202   : > { %v555_v15 = vmul.f32 %v820_v44, %v554_v63 }
 0x203   : > { %vm557_vm13 = vcmp.lt.f32.partialorder %v556_v3, 0.0004427343 }
 0x207   : > { %v822_v56 = vpop.eup %821 }
 0x208   : > { %v824_v59 = vpop.eup %823  ;;  %v561_v60 = vmul.f32 0.6931472, %v822_v56 }
 0x209   : > { %v826_v0 = vpop.eup %825  ;;  %v543_v1 = vmul.f32 0.6931472, %v824_v59 }
 0x20a   : > { %v567_v4 = vsel %vm566_vm10, %v564_v61, %v561_v60  ;;  %v570_v5 = vmul.f32 0.6931472, %v826_v0  ;;  %v828_v7 = vpop.eup %827 }
 0x20b   : > { %v579_v8 = vadd.f32 %v567_v4, %v515_v57  ;;  %v549_v9 = vsel %vm548_vm11, %v546_v2, %v543_v1  ;;  %v552_v14 = vmul.f32 0.6931472, %v828_v7 }
 0x20c   : > { %v576_v12 = vsel %vm575_vm12, %v573_v6, %v570_v5  ;;  %v577_v17 = vadd.f32 %v549_v9, %v513_v62 }
 0x20d   : > { %v580_v18 = vadd.f32 %v576_v12, %v516_v10  ;;  %v558_v16 = vsel %vm557_vm13, %v555_v15, %v552_v14  ;;  %v583_v13 = vsel %vm519_vm14, %v944_v20, %v579_v8  ;;  %v744_v20 = vld [vmem:[%s991_s6] ss:$0 sm:$0xff] }
 0x20e   : > { %v578_v21 = vadd.f32 %v558_v16, %v514_v11  ;;  %v581_v24 = vsel %vm517_vm0, %v946_v22, %v577_v17 }
 0x20f   : > { %v584_v19 = vsel %vm520_vm15, %v949_v25, %v580_v18 }
 0x210   : > { %v586_v23 = vpack.c.bf16 %v584_v19, %v583_v13  ;;  %v582_v26 = vsel %vm518_vm1, %v952_v28, %v578_v21 }
 0x211   : > { %v585_v27 = vpack.c.bf16 %v582_v26, %v581_v24 }
 0x213   : > { %780 = vmatprep.mubr.msk.bf16.mxu0 %vm457_vm9, %v585_v27 }
 0x214   : > { %781 = vmatmul.mubr.msk.bf16.vlgmr.msra.gmra.mrb[4].mxu0 %vm457_vm9, %v586_v23 }
 0x2e7   : > { %v782_v25 = vpop.f32.mrb[4].mxu0 }
 0x2e8   : > { %v650_v29 = vpop.f32.mrb[5].mxu0  ;;  %v659_v32 = vadd.f32 %v782_v25, %v744_v20 }
 0x2e9   : > { %v651_v22 = vadd.f32 %v744_v20, %v650_v29  ;;  %v783_v30 = vpop.f32.mrb[6].mxu0 }
 0x2ea   : > { %v653_v28 = vpop.f32.mrb[7].mxu0  ;;  %v662_v33 = vadd.f32 %v783_v30, %v744_v20  ;;  %668 = vst.msk [vmem:[%s280_s27 + $0x10] sm:$0xff] %vm665_vm2, %v659_v32 }
 0x2eb   : > { %666 = vst.msk [vmem:[%s280_s27] sm:$0xff] %vm665_vm2, %v651_v22  ;;  %v654_v31 = vadd.f32 %v744_v20, %v653_v28 }
 0x2ec   : > { %669 = vst.msk [vmem:[%s280_s27 + $0x18] sm:$0xff] %vm665_vm2, %v662_v33 }
 0x2ed   : > { %667 = vst.msk [vmem:[%s280_s27 + $0x8] sm:$0xff] %vm665_vm2, %v654_v31 }
 0x2ee PF: > { %s17_s24 = sadd.s32 1, %s835_s24  }
 0x2ef   : > { %p14_p4 = scmp.ge.s32.totalorder %s17_s24, 4  }
 0x2f1   :  { %16 = sbr.rel (!%p14_p4) target bundleno = 1 (0x1), region = 78 }

</bundles_post_ra>
